<compile_context>
chip_gen: v5e
topology: v5e:2x2
jax: 0.10.0
libtpu: 0.0.40
codegen_flags: <defaults>
</compile_context>

<pallas_src>
import functools

import jax
import jax.numpy as jnp
from jax import lax
from jax.scipy.linalg import solve_triangular
from jax.experimental import pallas as pl
from jax.experimental.pallas import tpu as pltpu


def _round_up(a, b):
    return (a + b - 1) // b * b


@functools.lru_cache(maxsize=1)
def _vmem_capacity_bytes():
    # Generation-aware VMEM capacity (128 MiB on v5e/v6e, 64 MiB on v7x).
    try:
        return int(pltpu.get_tpu_info().vmem_capacity_bytes)
    except Exception:
        return 64 * 1024 * 1024  # conservative fallback (v7x-sized)


def _sublane_align(dtype):
    # Min sublane multiple for a tile: 8 (f32), 16 (bf16), 32 (int8).
    return max(8, 32 // jnp.dtype(dtype).itemsize)


def _householder_product(vectors):
    """Q = H_0 H_1 ... H_{m-1}, H_i = I - 2 v_i v_i^T (rows L2-normalized).

    Compact-WY form: Q = I - V T V^T with T^{-1} = 0.5*I + triu(V^T V, 1),
    i.e. two dense matmuls + one small triangular solve (MXU-friendly) instead
    of an m-step sequential rank-1 chain.  Computed in f32.  A zero-norm row
    yields NaN, same as the reference module.
    """
    v = vectors.astype(jnp.float32)
    vn = v * lax.rsqrt(jnp.sum(v * v, axis=1, keepdims=True))      # (m, dim)
    m, dim = vn.shape
    t_inv = 0.5 * jnp.eye(m, dtype=jnp.float32) + jnp.triu(vn @ vn.T, k=1)
    w = solve_triangular(t_inv, vn, lower=False)                   # W = T @ Vn, (m, dim)
    return jnp.eye(dim, dtype=jnp.float32) - vn.T @ w              # (dim, dim)


def _mm_bias_kernel(x_ref, q_ref, b_ref, o_ref):
    # One MXU matmul per row tile: (tm, d_in) @ (d_in, d_out), f32 accumulate.
    acc = jnp.dot(x_ref[...], q_ref[...], preferred_element_type=jnp.float32)
    o_ref[...] = (acc + b_ref[...]).astype(o_ref.dtype)


def _mm_kernel(x_ref, q_ref, o_ref):
    acc = jnp.dot(x_ref[...], q_ref[...], preferred_element_type=jnp.float32)
    o_ref[...] = acc.astype(o_ref.dtype)


@functools.partial(jax.jit, static_argnames=("tile_rows",))
def householder_linear(x, vectors, bias=None, *, tile_rows=4096):
    """x: (..., dim); vectors: (m, dim); bias: (dim,) or None."""
    dim = x.shape[-1]
    assert vectors.shape[-1] == dim
    orig_shape = x.shape
    out_dtype = x.dtype

    # ---- one-time parameter work (hoisted out of the per-tile hot path) -----
    q = _householder_product(vectors)                                # (dim, dim) f32
    bias_f32 = None if bias is None else bias.astype(jnp.float32).reshape(1, dim)

    # Native MXU operand dtype: bf16 stays bf16 (f32 accumulate), else f32.
    op_dtype = jnp.bfloat16 if x.dtype == jnp.bfloat16 else jnp.float32
    x2 = x.reshape(-1, dim).astype(op_dtype)                         # no-op for f32/bf16
    n = x2.shape[0]

    # ---- lane-density plan ---------------------------------------------------
    if dim % 128 == 0:
        p, d_in, d_out = 1, dim, dim                 # already lane-dense
    elif 128 % dim == 0:
        p = 128 // dim                               # pack p rows per 128-wide row
        d_in = d_out = 128
    else:
        p = 1
        d_in = dim                                   # x fed unpadded (full-dim block)
        d_pad = _round_up(dim, 128)
        # Zero-pad only Q's output columns so stores are unmasked; skip when the
        # padding would more than double the output traffic.
        d_out = d_pad if d_pad <= 2 * dim else dim

    if p > 1:
        q_big = jnp.kron(jnp.eye(p, dtype=jnp.float32), q).astype(op_dtype)  # (128,128)
        b_big = None if bias_f32 is None else jnp.tile(bias_f32, (1, p))     # (1,128)
        n_main = (n // p) * p
        n_tail = n - n_main
        x_main = x2 if n_tail == 0 else lax.slice_in_dim(x2, 0, n_main, axis=0)
        xk = x_main.reshape(n_main // p, d_in)       # free reshape (row-major)
    else:
        if d_out != dim:
            q_big = jnp.pad(q, ((0, 0), (0, d_out - dim))).astype(op_dtype)
            b_big = None if bias_f32 is None else jnp.pad(bias_f32, ((0, 0), (0, d_out - dim)))
        else:
            q_big = q.astype(op_dtype)
            b_big = bias_f32
        n_main, n_tail = n, 0
        xk = x2

    n_rows = xk.shape[0]

    if n_rows > 0:
        # ---- tile sizing: generation-aware VMEM budget, Q counted as resident ----
        op_size = jnp.dtype(op_dtype).itemsize
        out_size = jnp.dtype(out_dtype).itemsize
        row_align = max(_sublane_align(op_dtype), _sublane_align(out_dtype))

        vmem_cap = _vmem_capacity_bytes()
        tile_budget = vmem_cap // 4
        # Q + bias are double-buffered by the pipeline despite the constant index_map.
        # TODO(synk): single-buffer Q (pl.Buffered(1) / manual scratch DMA) and tile the
        #             contraction axis with an accumulator for very large dim.
        resident = 2 * d_in * d_out * op_size + 2 * d_out * 4
        bytes_per_row = 2 * d_in * op_size + 2 * d_out * out_size   # x + out, double-buffered
        avail = tile_budget - resident
        if avail < bytes_per_row * row_align:
            avail = bytes_per_row * row_align * 4
        cap_rows = max(row_align, (avail // bytes_per_row) // row_align * row_align)

        # Keep >= ~8 grid steps so both v7x TensorCores stay busy on the parallel axis.
        steps_cap = _round_up(pl.cdiv(n_rows, 8), row_align)

        tm = min(_round_up(tile_rows, row_align), cap_rows, steps_cap)
        tm = max(tm, row_align)
        if n_rows <= tm:
            tm = n_rows                                # single block == full array dims
        grid = (pl.cdiv(n_rows, tm),)                  # ragged last block masked by Pallas

        vmem_limit = int(vmem_cap * 3 // 4)

        x_spec = pl.BlockSpec((tm, d_in), lambda i: (i, 0))
        q_spec = pl.BlockSpec((d_in, d_out), lambda i: (0, 0))      # resident across steps
        o_spec = pl.BlockSpec((tm, d_out), lambda i: (i, 0))
        cparams = pltpu.CompilerParams(
            dimension_semantics=("parallel",),
            vmem_limit_bytes=vmem_limit,
        )

        if b_big is not None:
            b_spec = pl.BlockSpec((1, d_out), lambda i: (0, 0))     # resident
            out_main = pl.pallas_call(
                _mm_bias_kernel,
                out_shape=jax.ShapeDtypeStruct((n_rows, d_out), out_dtype),
                grid=grid,
                in_specs=[x_spec, q_spec, b_spec],
                out_specs=o_spec,
                compiler_params=cparams,
            )(xk, q_big, b_big)
        else:
            out_main = pl.pallas_call(
                _mm_kernel,
                out_shape=jax.ShapeDtypeStruct((n_rows, d_out), out_dtype),
                grid=grid,
                in_specs=[x_spec, q_spec],
                out_specs=o_spec,
                compiler_params=cparams,
            )(xk, q_big)
    else:
        out_main = jnp.zeros((0, d_out), dtype=out_dtype)

    # ---- un-pack / tail / column-slice -----------------------------------------
    if p > 1:
        out2 = out_main.reshape(n_main, dim)          # free reshape
        if n_tail:
            # < p rows: tiny pure-JAX matmul instead of padding all of x.
            x_tail = lax.slice_in_dim(x2, n_main, n, axis=0).astype(jnp.float32)
            t = x_tail @ q
            if bias_f32 is not None:
                t = t + bias_f32
            out2 = jnp.concatenate([out2, t.astype(out_dtype)], axis=0)
    else:
        out2 = out_main if d_out == dim else out_main[:, :dim]

    return out2.reshape(orig_shape)


def householder_linear_ref(x, vectors, bias=None):
    """Pure-JAX reference mirroring the PyTorch sequential reflection loop."""
    vn = vectors / jnp.linalg.norm(vectors, axis=1, keepdims=True)
    out = x
    for i in range(vectors.shape[0]):
        v = vn[i]
        proj = jnp.einsum('...d,d->...', out, v)
        out = out - 2.0 * jnp.einsum('...,d->...d', proj, v)
    return out + bias if bias is not None else out


if __name__ == "__main__":
    dim = 32          # hidden size
    m = dim           # num_reflections defaults to dim
    batch, seq = 2, 8

    key = jax.random.PRNGKey(0)
    k_v, k_x = jax.random.split(key)

    # Deterministic parameter init (mirrors torch.randn(m, dim) * 0.01, zeros bias)
    vectors = jax.random.normal(k_v, (m, dim), dtype=jnp.float32) * 0.01
    bias = jnp.zeros((dim,), dtype=jnp.float32)

    x = jax.random.normal(k_x, (batch, seq, dim), dtype=jnp.float32)

    out = householder_linear(x, vectors, bias)
    out = jax.block_until_ready(out)

    ref = householder_linear_ref(x, vectors, bias)
    assert out.shape == x.shape
    assert jnp.allclose(out, ref, atol=1e-4, rtol=1e-4), "mismatch vs reference"

    print("KERNEL_OK")
</pallas_src>

<mosaic_0001>
module attributes {stable_mosaic.version = 11 : i64} {
  func.func @_mm_bias_kernel(%arg0: i32, %arg1: memref<4x128xf32, #tpu.memory_space<vmem>>, %arg2: memref<128x128xf32, #tpu.memory_space<vmem>>, %arg3: memref<1x128xf32, #tpu.memory_space<vmem>>, %arg4: memref<4x128xf32, #tpu.memory_space<vmem>>) attributes {dimension_semantics = [#tpu.dimension_semantics<parallel>], iteration_bounds = array<i64: 1>, scalar_prefetch = 0 : i64, scratch_operands = 0 : i64, tpu.core_type = #tpu.core_type<tc>, window_params = [{transform_indices = @transform_0, window_bounds = array<i64: 4, 128>}, {pipeline_mode = #tpu.pipeline_mode<synchronous>, transform_indices = @transform_1, window_bounds = array<i64: 128, 128>}, {pipeline_mode = #tpu.pipeline_mode<synchronous>, transform_indices = @transform_2, window_bounds = array<i64: 1, 128>}, {transform_indices = @transform_3, window_bounds = array<i64: 4, 128>}]} {
    %c0 = arith.constant 0 : index
    %c0_0 = arith.constant 0 : index
    %0 = vector.load %arg1[%c0, %c0_0] : memref<4x128xf32, #tpu.memory_space<vmem>>, vector<4x128xf32>
    %c0_1 = arith.constant 0 : index
    %c0_2 = arith.constant 0 : index
    %1 = vector.load %arg2[%c0_1, %c0_2] : memref<128x128xf32, #tpu.memory_space<vmem>>, vector<128x128xf32>
    %cst = arith.constant dense<0.000000e+00> : vector<4x128xf32>
    %2 = tpu.matmul %0, %1, %cst {dimension_numbers = #tpu.dot_dimension_numbers<[1], [0], [0], [1], [0, 0, 1, 1], [], []>} : vector<4x128xf32>, vector<128x128xf32>, vector<4x128xf32> -> vector<4x128xf32>
    %c0_3 = arith.constant 0 : index
    %c0_4 = arith.constant 0 : index
    %3 = vector.load %arg3[%c0_3, %c0_4] : memref<1x128xf32, #tpu.memory_space<vmem>>, vector<1x128xf32>
    %4 = vector.broadcast %3 : vector<1x128xf32> to vector<4x128xf32>
    %5 = arith.addf %2, %4 : vector<4x128xf32>
    %c0_5 = arith.constant 0 : index
    %c0_6 = arith.constant 0 : index
    %6 = vector.load %arg4[%c0_5, %c0_6] : memref<4x128xf32, #tpu.memory_space<vmem>>, vector<4x128xf32>
    tpu.vector_store %arg4[%c0_5, %c0_6], %5 {strides = array<i32>} : memref<4x128xf32, #tpu.memory_space<vmem>>, vector<4x128xf32>,
    return
  }
  func.func @transform_0(%arg0: i32) -> (i32, i32) {
    %c0_i32 = arith.constant 0 : i32
    %c0_i32_0 = arith.constant 0 : i32
    return %arg0, %c0_i32 : i32, i32
  }
  func.func @transform_1(%arg0: i32) -> (i32, i32) {
    %c0_i32 = arith.constant 0 : i32
    %c0_i32_0 = arith.constant 0 : i32
    %c0_i32_1 = arith.constant 0 : i32
    return %c0_i32, %c0_i32_0 : i32, i32
  }
  func.func @transform_2(%arg0: i32) -> (i32, i32) {
    %c0_i32 = arith.constant 0 : i32
    %c0_i32_0 = arith.constant 0 : i32
    %c0_i32_1 = arith.constant 0 : i32
    return %c0_i32, %c0_i32_0 : i32, i32
  }
  func.func @transform_3(%arg0: i32) -> (i32, i32) {
    %c0_i32 = arith.constant 0 : i32
    %c0_i32_0 = arith.constant 0 : i32
    return %arg0, %c0_i32 : i32, i32
  }
}

</mosaic_0001>

<bundles_post_ra>
// kernel: custom-call.2
= control target key start
LH: loop header
LB: loop body
LE: loop exit
PB: predicated region body
PF: predicated region fallthrough
CT: control target
= control target key end

     0   :  { %v47_v0 = vlaneseq  ;;  %v835_v19 = vmov -1.0   ;;  %s1141_s0 = inlined_call_operand.vmem [shape: f32[1,32,32], index: 0, kind: input, shape index: {}]   ;;  %s1142_s1 = inlined_call_operand.vmem [shape: f32[1,32,32], index: 1, kind: output, shape index: {}]  }
   0x1   :  { %v42_v3 = vld [vmem:[%s1141_s0 + $0x18] sm:$0xff]  ;;  %v40_v35 = vld [vmem:[%s1141_s0 + $0x10] sm:$0xff] }
   0x2   :  { %v847_v1 = vand.u32 127, %v47_v0  ;;  %v849_v2 = vshrl.u32 %v47_v0, 7 }
   0x4   :  { %v139_v4 = vadd.s32 24, %v849_v2  ;;  %vm49_vm1 = vcmp.lt.s32.totalorder %v847_v1, 32  ;;  %vm193_vm8 = vcmp.eq.s32.totalorder %v847_v1, 31  ;;  %vm201_vm10 = vcmp.eq.s32.totalorder %v847_v1, 30 }
   0x5   :  { %v194_v20 = vsel %vm193_vm8, 1.0, %v835_v19  ;;  %vm211_vm11 = vcmp.eq.s32.totalorder %v847_v1, 29  ;;  %v110_v36 = vadd.s32 16, %v849_v2  ;;  %vm221_vm13 = vcmp.eq.s32.totalorder %v847_v1, 28 }
   0x6   :  { %vm140_vm0 = vcmp.eq.s32.totalorder %v139_v4, %v847_v1  ;;  %vm145_vm2 = vcmp.le.s32.totalorder %v139_v4, %v847_v1  ;;  %vm190_vm9 = vcmp.eq.s32.totalorder %v847_v1, %v139_v4 }
   0x7   :  { %v142_v5 = vsel %vm140_vm0, %v42_v3, 0.0  ;;  %vm146_vm3 = vmand %vm145_vm2, %vm49_vm1  ;;  %v195_v21 = vsel %vm190_vm9, %v194_v20, 0.0  ;;  %vm111_vm12 = vcmp.eq.s32.totalorder %v110_v36, %v847_v1  ;;  %vm116_vm14 = vcmp.le.s32.totalorder %v110_v36, %v847_v1 }
   0x8   :  { %143 = vadd.xlane.f32.xlu0 %v142_v5  ;;  %v147_v14 = vsel %vm146_vm3, %v42_v3, 0.0  ;;  %v113_v37 = vsel %vm111_vm12, %v40_v35, 0.0  ;;  %vm117_vm2 = vmand %vm116_vm14, %vm49_vm1  ;;  %vm183_vm8 = vcmp.eq.s32.totalorder %v847_v1, %v110_v36  ;;  %vm251_vm9 = vcmp.eq.s32.totalorder %v847_v1, 25 }
   0x9   :  { %v118_v52 = vsel %vm117_vm2, %v40_v35, 0.0  ;;  %vm285_vm12 = vcmp.eq.s32.totalorder %v847_v1, 22  ;;  %vm313_vm14 = vcmp.eq.s32.totalorder %v847_v1, 20  ;;  %vm341_vm2 = vcmp.eq.s32.totalorder %v847_v1, 18 }
  0x7b   :  { %v856_v6 = vpop.xlane.xlu0 %143 }
  0x7c   :  { %827 = vrcp.f32 %v856_v6  ;;  %v159_v10 = vand.u32 2147483648, %v856_v6  ;;  %v157_v12 = vand.u32 2147483647, %v856_v6  ;;  %vm153_vm5 = vweird.f32 %v856_v6 }
  0x7e   :  { %v160_v15 = vor.u32 1.1754944e-38, %v159_v10  ;;  %vm158_vm7 = vcmp.eq.f32.partialorder %v157_v12, 8.507059e+37 }
  0x82   :  { %v828_v7 = vpop.eup %827 }
  0x83   :  { %v149_v8 = vmul.f32 %v828_v7, %v856_v6  ;;  %vm154_vm4 = vweird.f32 %v828_v7 }
  0x84   :  { %vm155_vm6 = vmor %vm153_vm5, %vm154_vm4 }
  0x85   :  { %v150_v9 = vsub.f32 1.0, %v149_v8 }
  0x87   :  { %v151_v11 = vmul.f32 %v828_v7, %v150_v9 }
  0x89   :  { %v152_v13 = vadd.f32 %v828_v7, %v151_v11 }
  0x8b   :  { %v156_v16 = vsel %vm155_vm6, %v828_v7, %v152_v13  ;;  %vm231_vm6 = vcmp.eq.s32.totalorder %v847_v1, 27  ;;  %v836_v7 = vmov 0.0  }
  0x8c   :  { %v869_v17 = vsel %vm158_vm7, %v160_v15, %v156_v16  ;;  %vm241_vm7 = vcmp.eq.s32.totalorder %v847_v1, 26  ;;  %v184_v8 = vsel %vm183_vm8, -1.0, %v836_v7 }
  0x8d   :  { %v162_v18 = vmul.f32 %v869_v17, %v147_v14 }
  0x8f   :  { %163 = vst [vmem:[#allocation2 + $0x18] sm:$0xff] %v162_v18 }
  0x96   :  { %v197_v22 = vld [vmem:[#allocation2 + $0x1e] ss:$0 sm:$0xff]  ;;  %v207_v25 = vld [vmem:[#allocation2 + $0x1d] ss:$0 sm:$0xff]  ;;  %v217_v30 = vld [vmem:[#allocation2 + $0x1c] ss:$0 sm:$0xff] }
  0x97   :  { %v198_v23 = vxor.u32 2147483648, %v197_v22  ;;  %v208_v27 = vxor.u32 2147483648, %v207_v25  ;;  %v218_v32 = vxor.u32 2147483648, %v217_v30  ;;  %v227_v38 = vld [vmem:[#allocation2 + $0x1b] ss:$0 sm:$0xff] }
  0x98   :  { %v228_v40 = vxor.u32 2147483648, %v227_v38  ;;  %v237_v56 = vld [vmem:[#allocation2 + $0x1a] ss:$0 sm:$0xff]  ;;  %v247_v61 = vld [vmem:[#allocation2 + $0x19] ss:$0 sm:$0xff] }
  0x99   :  { %v202_v24 = vmul.f32 %v198_v23, %v195_v21  ;;  %v238_v58 = vxor.u32 2147483648, %v237_v56  ;;  %v248_v63 = vxor.u32 2147483648, %v247_v61  ;;  %v257_v10 = vld [vmem:[#allocation2 + $0x18] ss:$0 sm:$0xff] }
  0x9a   :  { %v258_v12 = vxor.u32 2147483648, %v257_v10 }
  0x9b   :  { %203 = vadd.xlane.f32.xlu0 %v202_v24 }
 0x10e   :  { %v204_v26 = vpop.xlane.xlu0 %203 }
 0x10f   :  { %v205_v28 = vsel %vm201_vm10, %v204_v26, %v195_v21  ;;  %vm271_vm10 = vcmp.eq.s32.totalorder %v847_v1, 23 }
 0x110   :  { %v212_v29 = vmul.f32 %v208_v27, %v205_v28 }
 0x112   :  { %213 = vadd.xlane.f32.xlu1 %v212_v29 }
 0x185   :  { %v214_v31 = vpop.xlane.xlu1 %213 }
 0x186   :  { %v215_v33 = vsel %vm211_vm11, %v214_v31, %v205_v28  ;;  %vm261_vm11 = vcmp.eq.s32.totalorder %v847_v1, 24 }
 0x187   :  { %v222_v34 = vmul.f32 %v218_v32, %v215_v33 }
 0x189   :  { %223 = vadd.xlane.f32.xlu1 %v222_v34 }
 0x191   :  { %114 = vadd.xlane.f32.xlu1 %v113_v37 }
 0x1fc   :  { %v224_v39 = vpop.xlane.xlu1 %223 }
 0x1fd   :  { %v225_v41 = vsel %vm221_vm13, %v224_v39, %v215_v33  ;;  %vm299_vm13 = vcmp.eq.s32.totalorder %v847_v1, 21 }
 0x1fe   :  { %v232_v42 = vmul.f32 %v228_v40, %v225_v41 }
 0x200   :  { %233 = vadd.xlane.f32.xlu2 %v232_v42 }
 0x204   :  { %v882_v43 = vpop.xlane.xlu1 %114 }
 0x205   :  { %829 = vrcp.f32 %v882_v43  ;;  %v130_v46 = vand.u32 2147483648, %v882_v43  ;;  %vm124_vm15 = vweird.f32 %v882_v43  ;;  %v128_v48 = vand.u32 2147483647, %v882_v43 }
 0x207   :  { %v131_v50 = vor.u32 1.1754944e-38, %v130_v46  ;;  %vm129_vm4 = vcmp.eq.f32.partialorder %v128_v48, 8.507059e+37 }
 0x20b   :  { %v830_v44 = vpop.eup %829 }
 0x20c   :  { %v120_v45 = vmul.f32 %v830_v44, %v882_v43  ;;  %vm125_vm0 = vweird.f32 %v830_v44 }
 0x20d   :  { %vm126_vm3 = vmor %vm124_vm15, %vm125_vm0  ;;  %vm327_vm0 = vcmp.eq.s32.totalorder %v847_v1, 19 }
 0x20e   :  { %v121_v47 = vsub.f32 1.0, %v120_v45 }
 0x210   :  { %v122_v49 = vmul.f32 %v830_v44, %v121_v47 }
 0x212   :  { %v123_v51 = vadd.f32 %v830_v44, %v122_v49 }
 0x214   :  { %v127_v53 = vsel %vm126_vm3, %v830_v44, %v123_v51  ;;  %vm355_vm3 = vcmp.eq.s32.totalorder %v847_v1, 17 }
 0x215   :  { %v894_v54 = vsel %vm129_vm4, %v131_v50, %v127_v53 }
 0x216   :  { %v133_v55 = vmul.f32 %v894_v54, %v118_v52 }
 0x218   :  { %134 = vst [vmem:[#allocation2 + $0x10] sm:$0xff] %v133_v55 }
 0x21f   :  { %v267_v3 = vld [vmem:[#allocation2 + $0x17] ss:$0 sm:$0xff]  ;;  %v281_v15 = vld [vmem:[#allocation2 + $0x16] ss:$0 sm:$0xff]  ;;  %v295_v24 = vld [vmem:[#allocation2 + $0x15] ss:$0 sm:$0xff] }
 0x220   :  { %v268_v5 = vxor.u32 2147483648, %v267_v3  ;;  %v282_v16 = vxor.u32 2147483648, %v281_v15  ;;  %v296_v26 = vxor.u32 2147483648, %v295_v24  ;;  %v309_v32 = vld [vmem:[#allocation2 + $0x14] ss:$0 sm:$0xff] }
 0x221   :  { %v310_v34 = vxor.u32 2147483648, %v309_v32  ;;  %v323_v40 = vld [vmem:[#allocation2 + $0x13] ss:$0 sm:$0xff]  ;;  %v337_v49 = vld [vmem:[#allocation2 + $0x12] ss:$0 sm:$0xff] }
 0x222   :  { %v272_v9 = vmul.f32 %v268_v5, %v184_v8  ;;  %v324_v42 = vxor.u32 2147483648, %v323_v40  ;;  %v338_v51 = vxor.u32 2147483648, %v337_v49 }
 0x273   :  { %v234_v57 = vpop.xlane.xlu2 %233 }
 0x274   :  { %v235_v59 = vsel %vm231_vm6, %v234_v57, %v225_v41 }
 0x275   :  { %v242_v60 = vmul.f32 %v238_v58, %v235_v59  ;;  %v351_v58 = vld [vmem:[#allocation2 + $0x11] ss:$0 sm:$0xff] }
 0x277   :  { %243 = vadd.xlane.f32.xlu2 %v242_v60  ;;  %v352_v60 = vxor.u32 2147483648, %v351_v58 }
 0x2ea   :  { %v244_v62 = vpop.xlane.xlu2 %243 }
 0x2eb   :  { %v245_v0 = vsel %vm241_vm7, %v244_v62, %v235_v59 }
 0x2ec   :  { %v252_v4 = vmul.f32 %v248_v63, %v245_v0 }
 0x2ee   :  { %253 = vadd.xlane.f32.xlu0 %v252_v4  ;;  %v81_v4 = vadd.s32 8, %v849_v2 }
 0x2f0   :  { %vm82_vm4 = vcmp.eq.s32.totalorder %v81_v4, %v847_v1  ;;  %vm87_vm6 = vcmp.le.s32.totalorder %v81_v4, %v847_v1 }
 0x2f6   :  { %273 = vadd.xlane.f32.xlu0 %v272_v9 }
 0x361   :  { %v254_v11 = vpop.xlane.xlu0 %253 }
 0x362   :  { %v255_v13 = vsel %vm251_vm9, %v254_v11, %v245_v0  ;;  %vm88_vm9 = vmand %vm87_vm6, %vm49_vm1  ;;  %vm473_vm6 = vcmp.eq.s32.totalorder %v847_v1, 10 }
 0x363   :  { %v262_v14 = vmul.f32 %v258_v12, %v255_v13 }
 0x365   :  { %263 = vadd.xlane.f32.xlu2 %v262_v14 }
 0x369   :  { %v274_v18 = vpop.xlane.xlu0 %273 }
 0x36a   :  { %v275_v19 = vsel %vm271_vm10, %v274_v18, %v184_v8  ;;  %v38_v8 = vld [vmem:[%s1141_s0 + $0x8] sm:$0xff] }
 0x36b   :  { %v286_v20 = vmul.f32 %v282_v16, %v275_v19  ;;  %v84_v12 = vsel %vm82_vm4, %v38_v8, 0.0  ;;  %vm455_vm4 = vcmp.eq.s32.totalorder %v847_v1, 11 }
 0x36d   :  { %287 = vadd.xlane.f32.xlu2 %v286_v20 }
 0x3d8   :  { %v264_v21 = vpop.xlane.xlu2 %263 }
 0x3d9   :  { %v265_v22 = vsel %vm261_vm11, %v264_v21, %v255_v13 }
 0x3da   :  { %v276_v23 = vmul.f32 %v268_v5, %v265_v22  ;;  %v365_v5 = vld [vmem:[#allocation2 + $0x10] ss:$0 sm:$0xff] }
 0x3db   :  { %v366_v10 = vxor.u32 2147483648, %v365_v5 }
 0x3dc   :  { %277 = vadd.xlane.f32.xlu1 %v276_v23 }
 0x3e0   :  { %v288_v25 = vpop.xlane.xlu2 %287 }
 0x3e1   :  { %v289_v27 = vsel %vm285_vm12, %v288_v25, %v275_v19 }
 0x3e2   :  { %v300_v28 = vmul.f32 %v296_v26, %v289_v27 }
 0x3e4   :  { %301 = vadd.xlane.f32.xlu1 %v300_v28 }
 0x44f   :  { %v278_v29 = vpop.xlane.xlu1 %277 }
 0x450   :  { %v279_v30 = vsel %vm271_vm10, %v278_v29, %v265_v22 }
 0x451   :  { %v290_v31 = vmul.f32 %v282_v16, %v279_v30 }
 0x453   :  { %291 = vadd.xlane.f32.xlu0 %v290_v31 }
 0x457   :  { %v302_v33 = vpop.xlane.xlu1 %301 }
 0x458   :  { %v303_v35 = vsel %vm299_vm13, %v302_v33, %v289_v27  ;;  %v89_v27 = vsel %vm88_vm9, %v38_v8, 0.0  ;;  %vm491_vm9 = vcmp.eq.s32.totalorder %v847_v1, 9 }
 0x459   :  { %v314_v36 = vmul.f32 %v310_v34, %v303_v35 }
 0x45b   :  { %315 = vadd.xlane.f32.xlu0 %v314_v36 }
 0x4c6   :  { %v292_v37 = vpop.xlane.xlu0 %291 }
 0x4c7   :  { %v293_v38 = vsel %vm285_vm12, %v292_v37, %v279_v30  ;;  %vm176_vm12 = vcmp.eq.s32.totalorder %v847_v1, %v81_v4 }
 0x4c8   :  { %v304_v39 = vmul.f32 %v296_v26, %v293_v38  ;;  %v177_v33 = vsel %vm176_vm12, -1.0, %v836_v7 }
 0x4ca   :  { %305 = vadd.xlane.f32.xlu2 %v304_v39 }
 0x4ce   :  { %v316_v41 = vpop.xlane.xlu0 %315 }
 0x4cf   :  { %v317_v44 = vsel %vm313_vm14, %v316_v41, %v303_v35 }
 0x4d0   :  { %v328_v45 = vmul.f32 %v324_v42, %v317_v44 }
 0x4d2   :  { %329 = vadd.xlane.f32.xlu2 %v328_v45 }
 0x53d   :  { %v306_v46 = vpop.xlane.xlu2 %305 }
 0x53e   :  { %v307_v47 = vsel %vm299_vm13, %v306_v46, %v293_v38  ;;  %vm369_vm13 = vcmp.eq.s32.totalorder %v847_v1, 16 }
 0x53f   :  { %v318_v48 = vmul.f32 %v310_v34, %v307_v47 }
 0x541   :  { %319 = vadd.xlane.f32.xlu1 %v318_v48 }
 0x545   :  { %v330_v50 = vpop.xlane.xlu2 %329 }
 0x546   :  { %v331_v52 = vsel %vm327_vm0, %v330_v50, %v317_v44 }
 0x547   :  { %v342_v53 = vmul.f32 %v338_v51, %v331_v52 }
 0x549   :  { %343 = vadd.xlane.f32.xlu1 %v342_v53 }
 0x5b4   :  { %v320_v55 = vpop.xlane.xlu1 %319 }
 0x5b5   :  { %v321_v56 = vsel %vm313_vm14, %v320_v55, %v307_v47  ;;  %vm383_vm14 = vcmp.eq.s32.totalorder %v847_v1, 15 }
 0x5b6   :  { %v332_v57 = vmul.f32 %v324_v42, %v321_v56 }
 0x5b8   :  { %333 = vadd.xlane.f32.xlu0 %v332_v57 }
 0x5bc   :  { %v344_v59 = vpop.xlane.xlu1 %343 }
 0x5bd   :  { %v345_v61 = vsel %vm341_vm2, %v344_v59, %v331_v52 }
 0x5be   :  { %v356_v62 = vmul.f32 %v352_v60, %v345_v61 }
 0x5c0   :  { %357 = vadd.xlane.f32.xlu0 %v356_v62 }
 0x62b   :  { %v334_v63 = vpop.xlane.xlu0 %333 }
 0x62c   :  { %v335_v0 = vsel %vm327_vm0, %v334_v63, %v321_v56  ;;  %vm401_vm0 = vcmp.eq.s32.totalorder %v847_v1, 14 }
 0x62d   :  { %v346_v3 = vmul.f32 %v338_v51, %v335_v0 }
 0x62f   :  { %347 = vadd.xlane.f32.xlu2 %v346_v3 }
 0x633   :  { %v358_v9 = vpop.xlane.xlu0 %357 }
 0x634   :  { %v359_v11 = vsel %vm355_vm3, %v358_v9, %v345_v61 }
 0x635   :  { %v370_v13 = vmul.f32 %v366_v10, %v359_v11 }
 0x637   :  { %371 = vadd.xlane.f32.xlu0 %v370_v13  ;;  %85 = vadd.xlane.f32.xlu2 %v84_v12 }
 0x6a2   :  { %v348_v14 = vpop.xlane.xlu2 %347 }
 0x6a3   :  { %v349_v15 = vsel %vm341_vm2, %v348_v14, %v335_v0  ;;  %vm419_vm2 = vcmp.eq.s32.totalorder %v847_v1, 13 }
 0x6a4   :  { %v360_v16 = vmul.f32 %v352_v60, %v349_v15 }
 0x6a6   :  { %361 = vadd.xlane.f32.xlu1 %v360_v16 }
 0x6aa   :  { %v941_v18 = vpop.xlane.xlu2 %85  ;;  %v372_v31 = vpop.xlane.xlu0 %371 }
 0x6ab   :  { %831 = vrcp.f32 %v941_v18  ;;  %v101_v21 = vand.u32 2147483648, %v941_v18  ;;  %vm95_vm7 = vweird.f32 %v941_v18  ;;  %v99_v23 = vand.u32 2147483647, %v941_v18 }
 0x6ac   :  { %v373_v35 = vsel %vm369_vm13, %v372_v31, %v359_v11 }
 0x6ad   :  { %v102_v25 = vor.u32 1.1754944e-38, %v101_v21  ;;  %vm100_vm11 = vcmp.eq.f32.partialorder %v99_v23, 8.507059e+37 }
 0x6b1   :  { %v832_v19 = vpop.eup %831 }
 0x6b2   :  { %v91_v20 = vmul.f32 %v832_v19, %v941_v18  ;;  %vm96_vm8 = vweird.f32 %v832_v19 }
 0x6b3   :  { %vm97_vm10 = vmor %vm95_vm7, %vm96_vm8  ;;  %vm53_vm8 = vcmp.eq.s32.totalorder %v849_v2, %v847_v1 }
 0x6b4   :  { %v92_v22 = vsub.f32 1.0, %v91_v20 }
 0x6b6   :  { %v93_v24 = vmul.f32 %v832_v19, %v92_v22 }
 0x6b8   :  { %v94_v26 = vadd.f32 %v832_v19, %v93_v24 }
 0x6ba   :  { %v98_v28 = vsel %vm97_vm10, %v832_v19, %v94_v26  ;;  %vm58_vm10 = vcmp.le.s32.totalorder %v849_v2, %v847_v1 }
 0x6bb   :  { %v953_v29 = vsel %vm100_vm11, %v102_v25, %v98_v28 }
 0x6bc   :  { %v104_v30 = vmul.f32 %v953_v29, %v89_v27 }
 0x6be   :  { %105 = vst [vmem:[#allocation2 + $0x8] sm:$0xff] %v104_v30 }
 0x6c5   :  { %v379_v32 = vld [vmem:[#allocation2 + $0xf] ss:$0 sm:$0xff]  ;;  %v397_v41 = vld [vmem:[#allocation2 + $0xe] ss:$0 sm:$0xff]  ;;  %v415_v53 = vld [vmem:[#allocation2 + $0xd] ss:$0 sm:$0xff] }
 0x6c6   :  { %v380_v34 = vxor.u32 2147483648, %v379_v32  ;;  %v398_v42 = vxor.u32 2147483648, %v397_v41  ;;  %v416_v57 = vxor.u32 2147483648, %v415_v53  ;;  %v433_v3 = vld [vmem:[#allocation2 + $0xc] ss:$0 sm:$0xff] }
 0x6c7   :  { %v434_v8 = vxor.u32 2147483648, %v433_v3  ;;  %v451_v16 = vld [vmem:[#allocation2 + $0xb] ss:$0 sm:$0xff]  ;;  %v469_v30 = vld [vmem:[#allocation2 + $0xa] ss:$0 sm:$0xff] }
 0x6c8   :  { %v388_v36 = vmul.f32 %v380_v34, %v373_v35  ;;  %v384_v37 = vmul.f32 %v380_v34, %v177_v33  ;;  %v452_v21 = vxor.u32 2147483648, %v451_v16  ;;  %v487_v41 = vld [vmem:[#allocation2 + $0x9] ss:$0 sm:$0xff] }
 0x6ca   :  { %389 = vadd.xlane.f32.xlu0 %v388_v36  ;;  %385 = vadd.xlane.f32.xlu2 %v384_v37 }
 0x719   :  { %v362_v38 = vpop.xlane.xlu1 %361 }
 0x71a   :  { %v363_v39 = vsel %vm355_vm3, %v362_v38, %v349_v15  ;;  %vm437_vm3 = vcmp.eq.s32.totalorder %v847_v1, 12 }
 0x71b   :  { %v374_v40 = vmul.f32 %v366_v10, %v363_v39 }
 0x71d   :  { %375 = vadd.xlane.f32.xlu1 %v374_v40 }
 0x73d   :  { %v390_v44 = vpop.xlane.xlu0 %389  ;;  %v386_v45 = vpop.xlane.xlu2 %385 }
 0x73e   :  { %v391_v46 = vsel %vm383_vm14, %v390_v44, %v373_v35  ;;  %v387_v47 = vsel %vm383_vm14, %v386_v45, %v177_v33  ;;  %v470_v33 = vxor.u32 2147483648, %v469_v30  ;;  %v488_v45 = vxor.u32 2147483648, %v487_v41 }
 0x73f   :  { %v406_v48 = vmul.f32 %v398_v42, %v391_v46  ;;  %v402_v49 = vmul.f32 %v398_v42, %v387_v47 }
 0x741   :  { %407 = vadd.xlane.f32.xlu0 %v406_v48  ;;  %403 = vadd.xlane.f32.xlu2 %v402_v49 }
 0x790   :  { %v376_v50 = vpop.xlane.xlu1 %375 }
 0x791   :  { %v377_v51 = vsel %vm369_vm13, %v376_v50, %v363_v39  ;;  %v36_v50 = vld [vmem:[%s1141_s0] sm:$0xff]  ;;  %vm59_vm13 = vmand %vm58_vm10, %vm49_vm1  ;;  %vm509_vm1 = vcmp.eq.s32.totalorder %v847_v1, 8  ;;  %vm637_vm10 = vcmp.eq.s32.totalorder %v847_v1, 2 }
 0x792   :  { %v392_v52 = vmul.f32 %v380_v34, %v377_v51 }
 0x794   :  { %393 = vadd.xlane.f32.xlu1 %v392_v52 }
 0x7b4   :  { %v408_v55 = vpop.xlane.xlu0 %407  ;;  %v404_v56 = vpop.xlane.xlu2 %403 }
 0x7b5   :  { %v409_v58 = vsel %vm401_vm0, %v408_v55, %v391_v46  ;;  %v405_v59 = vsel %vm401_vm0, %v404_v56, %v387_v47  ;;  %v505_v56 = vld [vmem:[#allocation2 + $0x8] ss:$0 sm:$0xff] }
 0x7b6   :  { %v424_v60 = vmul.f32 %v416_v57, %v409_v58  ;;  %v420_v61 = vmul.f32 %v416_v57, %v405_v59 }
 0x7b8   :  { %425 = vadd.xlane.f32.xlu0 %v424_v60  ;;  %421 = vadd.xlane.f32.xlu2 %v420_v61 }
 0x807   :  { %v394_v62 = vpop.xlane.xlu1 %393 }
 0x808   :  { %v395_v63 = vsel %vm383_vm14, %v394_v62, %v377_v51  ;;  %v55_v51 = vsel %vm53_vm8, %v36_v50, 0.0  ;;  %vm593_vm8 = vcmp.eq.s32.totalorder %v847_v1, 4 }
 0x809   :  { %v410_v0 = vmul.f32 %v398_v42, %v395_v63 }
 0x80b   :  { %411 = vadd.xlane.f32.xlu1 %v410_v0 }
 0x82b   :  { %v426_v4 = vpop.xlane.xlu0 %425  ;;  %v422_v5 = vpop.xlane.xlu2 %421 }
 0x82c   :  { %v427_v9 = vsel %vm419_vm2, %v426_v4, %v409_v58  ;;  %v423_v10 = vsel %vm419_vm2, %v422_v5, %v405_v59  ;;  %v506_v58 = vxor.u32 2147483648, %v505_v56 }
 0x82d   :  { %v442_v11 = vmul.f32 %v434_v8, %v427_v9  ;;  %v438_v12 = vmul.f32 %v434_v8, %v423_v10 }
 0x82f   :  { %443 = vadd.xlane.f32.xlu0 %v442_v11  ;;  %439 = vadd.xlane.f32.xlu2 %v438_v12 }
 0x87e   :  { %v412_v13 = vpop.xlane.xlu1 %411 }
 0x87f   :  { %v413_v14 = vsel %vm401_vm0, %v412_v13, %v395_v63 }
 0x880   :  { %v428_v15 = vmul.f32 %v416_v57, %v413_v14 }
 0x882   :  { %429 = vadd.xlane.f32.xlu1 %v428_v15 }
 0x8a2   :  { %v444_v19 = vpop.xlane.xlu0 %443  ;;  %v440_v20 = vpop.xlane.xlu2 %439 }
 0x8a3   :  { %v445_v22 = vsel %vm437_vm3, %v444_v19, %v427_v9  ;;  %v441_v23 = vsel %vm437_vm3, %v440_v20, %v423_v10  ;;  %v60_v10 = vsel %vm59_vm13, %v36_v50, 0.0  ;;  %vm680_vm13 = vcmp.eq.s32.totalorder %v847_v1, 0 }
 0x8a4   :  { %v460_v24 = vmul.f32 %v452_v21, %v445_v22  ;;  %v456_v25 = vmul.f32 %v452_v21, %v441_v23 }
 0x8a6   :  { %461 = vadd.xlane.f32.xlu0 %v460_v24  ;;  %457 = vadd.xlane.f32.xlu2 %v456_v25 }
 0x8f5   :  { %v430_v26 = vpop.xlane.xlu1 %429 }
 0x8f6   :  { %v431_v27 = vsel %vm419_vm2, %v430_v26, %v413_v14  ;;  %vm169_vm2 = vcmp.eq.s32.totalorder %v847_v1, %v849_v2 }
 0x8f7   :  { %v446_v28 = vmul.f32 %v434_v8, %v431_v27  ;;  %v170_v14 = vsel %vm169_vm2, -1.0, %v836_v7 }
 0x8f9   :  { %447 = vadd.xlane.f32.xlu1 %v446_v28 }
 0x919   :  { %v462_v31 = vpop.xlane.xlu0 %461  ;;  %v458_v32 = vpop.xlane.xlu2 %457 }
 0x91a   :  { %v463_v34 = vsel %vm455_vm4, %v462_v31, %v445_v22  ;;  %v459_v35 = vsel %vm455_vm4, %v458_v32, %v441_v23 }
 0x91b   :  { %v478_v36 = vmul.f32 %v470_v33, %v463_v34  ;;  %v474_v37 = vmul.f32 %v470_v33, %v459_v35 }
 0x91d   :  { %479 = vadd.xlane.f32.xlu0 %v478_v36  ;;  %475 = vadd.xlane.f32.xlu2 %v474_v37 }
 0x96c   :  { %v448_v38 = vpop.xlane.xlu1 %447 }
 0x96d   :  { %v449_v39 = vsel %vm437_vm3, %v448_v38, %v431_v27  ;;  %vm527_vm3 = vcmp.eq.s32.totalorder %v847_v1, 7 }
 0x96e   :  { %v464_v40 = vmul.f32 %v452_v21, %v449_v39 }
 0x970   :  { %465 = vadd.xlane.f32.xlu1 %v464_v40 }
 0x990   :  { %v480_v42 = vpop.xlane.xlu0 %479  ;;  %v476_v44 = vpop.xlane.xlu2 %475 }
 0x991   :  { %v481_v46 = vsel %vm473_vm6, %v480_v42, %v463_v34  ;;  %v477_v47 = vsel %vm473_vm6, %v476_v44, %v459_v35 }
 0x992   :  { %v496_v48 = vmul.f32 %v488_v45, %v481_v46  ;;  %v492_v49 = vmul.f32 %v488_v45, %v477_v47 }
 0x994   :  { %497 = vadd.xlane.f32.xlu0 %v496_v48  ;;  %493 = vadd.xlane.f32.xlu2 %v492_v49 }
 0x99c   :  { %56 = vadd.xlane.f32.xlu2 %v55_v51 }
 0x9e3   :  { %v466_v52 = vpop.xlane.xlu1 %465 }
 0x9e4   :  { %v467_v53 = vsel %vm455_vm4, %v466_v52, %v449_v39  ;;  %vm549_vm4 = vcmp.eq.s32.totalorder %v847_v1, 6 }
 0x9e5   :  { %v482_v55 = vmul.f32 %v470_v33, %v467_v53 }
 0x9e7   :  { %483 = vadd.xlane.f32.xlu1 %v482_v55 }
 0xa07   :  { %v494_v57 = vpop.xlane.xlu2 %493  ;;  %v498_v23 = vpop.xlane.xlu0 %497 }
 0xa08   :  { %v495_v59 = vsel %vm491_vm9, %v494_v57, %v477_v47  ;;  %v499_v24 = vsel %vm491_vm9, %v498_v23, %v481_v46 }
 0xa09   :  { %v510_v60 = vmul.f32 %v506_v58, %v495_v59  ;;  %v514_v25 = vmul.f32 %v506_v58, %v499_v24 }
 0xa0b   :  { %511 = vadd.xlane.f32.xlu0 %v510_v60 }
 0xa0f   :  { %v1013_v61 = vpop.xlane.xlu2 %56 }
 0xa10   :  { %833 = vrcp.f32 %v1013_v61  ;;  %v72_v0 = vand.u32 2147483648, %v1013_v61  ;;  %vm66_vm11 = vweird.f32 %v1013_v61  ;;  %v70_v4 = vand.u32 2147483647, %v1013_v61 }
 0xa12   :  { %v73_v8 = vor.u32 1.1754944e-38, %v72_v0  ;;  %vm71_vm0 = vcmp.eq.f32.partialorder %v70_v4, 8.507059e+37 }
 0xa16   :  { %v834_v62 = vpop.eup %833 }
 0xa17   :  { %v62_v63 = vmul.f32 %v834_v62, %v1013_v61  ;;  %vm67_vm12 = vweird.f32 %v834_v62 }
 0xa18   :  { %vm68_vm14 = vmor %vm66_vm11, %vm67_vm12  ;;  %vm659_vm12 = vcmp.eq.s32.totalorder %v847_v1, 1 }
 0xa19   :  { %v63_v3 = vsub.f32 1.0, %v62_v63 }
 0xa1b   :  { %v64_v5 = vmul.f32 %v834_v62, %v63_v3 }
 0xa1d   :  { %v65_v9 = vadd.f32 %v834_v62, %v64_v5 }
 0xa1f   :  { %v69_v11 = vsel %vm68_vm14, %v834_v62, %v65_v9 }
 0xa20   :  { %v1026_v12 = vsel %vm71_vm0, %v73_v8, %v69_v11 }
 0xa21   :  { %v75_v13 = vmul.f32 %v1026_v12, %v60_v10 }
 0xa23   :  { %76 = vst [vmem:[#allocation2] sm:$0xff] %v75_v13 }
 0xa2a   :  { %v523_v15 = vld [vmem:[#allocation2 + $0x7] ss:$0 sm:$0xff]  ;;  %v545_v27 = vld [vmem:[#allocation2 + $0x6] ss:$0 sm:$0xff]  ;;  %v567_v42 = vld [vmem:[#allocation2 + $0x5] ss:$0 sm:$0xff] }
 0xa2b   :  { %v524_v16 = vxor.u32 2147483648, %v523_v15  ;;  %v546_v28 = vxor.u32 2147483648, %v545_v27  ;;  %v568_v44 = vxor.u32 2147483648, %v567_v42 }
 0xa2d   :  { %v528_v19 = vmul.f32 %v524_v16, %v170_v14 }
 0xa2f   :  { %529 = vadd.xlane.f32.xlu0 %v528_v19 }
 0xa5a   :  { %v484_v20 = vpop.xlane.xlu1 %483 }
 0xa5b   :  { %v485_v21 = vsel %vm473_vm6, %v484_v20, %v467_v53  ;;  %vm571_vm6 = vcmp.eq.s32.totalorder %v847_v1, 5 }
 0xa5c   :  { %v500_v22 = vmul.f32 %v488_v45, %v485_v21 }
 0xa5e   :  { %501 = vadd.xlane.f32.xlu1 %v500_v22 }
 0xa66   :  { %515 = vadd.xlane.f32.xlu1 %v514_v25 }
 0xa7e   :  { %v512_v2 = vpop.xlane.xlu0 %511 }
 0xa7f   :  { %v513_v7 = vsel %vm509_vm1, %v512_v2, %v495_v59 }
 0xa80   :  { %v532_v26 = vmul.f32 %v524_v16, %v513_v7 }
 0xa82   :  { %533 = vadd.xlane.f32.xlu1 %v532_v26 }
 0xaa2   :  { %v530_v30 = vpop.xlane.xlu0 %529 }
 0xaa3   :  { %v531_v31 = vsel %vm527_vm3, %v530_v30, %v170_v14  ;;  %v611_v14 = vld [vmem:[#allocation2 + $0x3] ss:$0 sm:$0xff] }
 0xaa4   :  { %v550_v32 = vmul.f32 %v546_v28, %v531_v31 }
 0xaa6   :  { %551 = vadd.xlane.f32.xlu1 %v550_v32 }
 0xad1   :  { %v502_v33 = vpop.xlane.xlu1 %501 }
 0xad2   :  { %v503_v34 = vsel %vm491_vm9, %v502_v33, %v485_v21  ;;  %vm615_vm9 = vcmp.eq.s32.totalorder %v847_v1, 3 }
 0xad3   :  { %v518_v35 = vmul.f32 %v506_v58, %v503_v34  ;;  %v589_v58 = vld [vmem:[#allocation2 + $0x4] ss:$0 sm:$0xff] }
 0xad4   :  { %v590_v60 = vxor.u32 2147483648, %v589_v58 }
 0xad5   :  { %519 = vadd.xlane.f32.xlu2 %v518_v35 }
 0xad9   :  { %v516_v36 = vpop.xlane.xlu1 %515 }
 0xada   :  { %v517_v37 = vsel %vm509_vm1, %v516_v36, %v499_v24 }
 0xadb   :  { %v536_v38 = vmul.f32 %v524_v16, %v517_v37 }
 0xadd   :  { %537 = vadd.xlane.f32.xlu2 %v536_v38 }
 0xaf5   :  { %v534_v39 = vpop.xlane.xlu1 %533 }
 0xaf6   :  { %v535_v40 = vsel %vm527_vm3, %v534_v39, %v513_v7 }
 0xaf7   :  { %v554_v41 = vmul.f32 %v546_v28, %v535_v40 }
 0xaf9   :  { %555 = vadd.xlane.f32.xlu2 %v554_v41 }
 0xb19   :  { %v552_v45 = vpop.xlane.xlu1 %551 }
 0xb1a   :  { %v553_v46 = vsel %vm549_vm4, %v552_v45, %v531_v31 }
 0xb1b   :  { %v572_v47 = vmul.f32 %v568_v44, %v553_v46 }
 0xb1d   :  { %573 = vadd.xlane.f32.xlu2 %v572_v47 }
 0xb48   :  { %v520_v48 = vpop.xlane.xlu2 %519 }
 0xb49   :  { %v521_v49 = vsel %vm509_vm1, %v520_v48, %v503_v34 }
 0xb4a   :  { %v540_v50 = vmul.f32 %v524_v16, %v521_v49  ;;  %v612_v16 = vxor.u32 2147483648, %v611_v14 }
 0xb4c   :  { %541 = vadd.xlane.f32.xlu0 %v540_v50 }
 0xb50   :  { %v538_v51 = vpop.xlane.xlu2 %537 }
 0xb51   :  { %v539_v52 = vsel %vm527_vm3, %v538_v51, %v517_v37 }
 0xb52   :  { %v558_v53 = vmul.f32 %v546_v28, %v539_v52 }
 0xb54   :  { %559 = vadd.xlane.f32.xlu0 %v558_v53 }
 0xb6c   :  { %v556_v55 = vpop.xlane.xlu2 %555 }
 0xb6d   :  { %v557_v56 = vsel %vm549_vm4, %v556_v55, %v535_v40 }
 0xb6e   :  { %v576_v57 = vmul.f32 %v568_v44, %v557_v56 }
 0xb70   :  { %577 = vadd.xlane.f32.xlu0 %v576_v57 }
 0xb90   :  { %v574_v59 = vpop.xlane.xlu2 %573 }
 0xb91   :  { %v575_v62 = vsel %vm571_vm6, %v574_v59, %v553_v46  ;;  %v676_v59 = vld [vmem:[#allocation2] ss:$0 sm:$0xff] }
 0xb92   :  { %v594_v63 = vmul.f32 %v590_v60, %v575_v62 }
 0xb94   :  { %595 = vadd.xlane.f32.xlu0 %v594_v63 }
 0xbbf   :  { %v542_v0 = vpop.xlane.xlu0 %541 }
 0xbc0   :  { %v543_v3 = vsel %vm527_vm3, %v542_v0, %v521_v49 }
 0xbc1   :  { %v562_v4 = vmul.f32 %v546_v28, %v543_v3  ;;  %v633_v28 = vld [vmem:[#allocation2 + $0x2] ss:$0 sm:$0xff] }
 0xbc2   :  { %v634_v31 = vxor.u32 2147483648, %v633_v28 }
 0xbc3   :  { %563 = vadd.xlane.f32.xlu1 %v562_v4 }
 0xbc7   :  { %v560_v5 = vpop.xlane.xlu0 %559 }
 0xbc8   :  { %v561_v8 = vsel %vm549_vm4, %v560_v5, %v539_v52 }
 0xbc9   :  { %v580_v9 = vmul.f32 %v568_v44, %v561_v8 }
 0xbcb   :  { %581 = vadd.xlane.f32.xlu1 %v580_v9 }
 0xbe3   :  { %v578_v10 = vpop.xlane.xlu0 %577 }
 0xbe4   :  { %v579_v11 = vsel %vm571_vm6, %v578_v10, %v557_v56 }
 0xbe5   :  { %v598_v13 = vmul.f32 %v590_v60, %v579_v11 }
 0xbe7   :  { %599 = vadd.xlane.f32.xlu1 %v598_v13 }
 0xc07   :  { %v596_v15 = vpop.xlane.xlu0 %595 }
 0xc08   :  { %v597_v19 = vsel %vm593_vm8, %v596_v15, %v575_v62  ;;  %v677_v62 = vxor.u32 2147483648, %v676_v59 }
 0xc09   :  { %v616_v20 = vmul.f32 %v612_v16, %v597_v19 }
 0xc0b   :  { %617 = vadd.xlane.f32.xlu1 %v616_v20 }
 0xc36   :  { %v564_v21 = vpop.xlane.xlu1 %563 }
 0xc37   :  { %v565_v22 = vsel %vm549_vm4, %v564_v21, %v543_v3 }
 0xc38   :  { %v584_v23 = vmul.f32 %v568_v44, %v565_v22  ;;  %v655_v44 = vld [vmem:[#allocation2 + $0x1] ss:$0 sm:$0xff] }
 0xc39   :  { %v656_v46 = vxor.u32 2147483648, %v655_v44 }
 0xc3a   :  { %585 = vadd.xlane.f32.xlu2 %v584_v23 }
 0xc3e   :  { %v582_v24 = vpop.xlane.xlu1 %581 }
 0xc3f   :  { %v583_v25 = vsel %vm571_vm6, %v582_v24, %v561_v8 }
 0xc40   :  { %v602_v2 = vmul.f32 %v590_v60, %v583_v25 }
 0xc42   :  { %603 = vadd.xlane.f32.xlu2 %v602_v2 }
 0xc5a   :  { %v600_v7 = vpop.xlane.xlu1 %599 }
 0xc5b   :  { %v601_v26 = vsel %vm593_vm8, %v600_v7, %v579_v11 }
 0xc5c   :  { %v620_v27 = vmul.f32 %v612_v16, %v601_v26 }
 0xc5e   :  { %621 = vadd.xlane.f32.xlu2 %v620_v27 }
 0xc7e   :  { %v618_v30 = vpop.xlane.xlu1 %617 }
 0xc7f   :  { %v619_v32 = vsel %vm615_vm9, %v618_v30, %v597_v19 }
 0xc80   :  { %v638_v33 = vmul.f32 %v634_v31, %v619_v32 }
 0xc82   :  { %639 = vadd.xlane.f32.xlu2 %v638_v33 }
 0xcad   :  { %v586_v34 = vpop.xlane.xlu2 %585 }
 0xcae   :  { %v587_v35 = vsel %vm571_vm6, %v586_v34, %v565_v22 }
 0xcaf   :  { %v606_v36 = vmul.f32 %v590_v60, %v587_v35 }
 0xcb1   :  { %607 = vadd.xlane.f32.xlu0 %v606_v36 }
 0xcb5   :  { %v604_v37 = vpop.xlane.xlu2 %603 }
 0xcb6   :  { %v605_v38 = vsel %vm593_vm8, %v604_v37, %v583_v25 }
 0xcb7   :  { %v624_v39 = vmul.f32 %v612_v16, %v605_v38 }
 0xcb9   :  { %625 = vadd.xlane.f32.xlu0 %v624_v39 }
 0xcd1   :  { %v622_v40 = vpop.xlane.xlu2 %621 }
 0xcd2   :  { %v623_v41 = vsel %vm615_vm9, %v622_v40, %v601_v26 }
 0xcd3   :  { %v642_v42 = vmul.f32 %v634_v31, %v623_v41 }
 0xcd5   :  { %643 = vadd.xlane.f32.xlu0 %v642_v42 }
 0xcf5   :  { %v640_v45 = vpop.xlane.xlu2 %639 }
 0xcf6   :  { %v641_v47 = vsel %vm637_vm10, %v640_v45, %v619_v32 }
 0xcf7   :  { %v660_v48 = vmul.f32 %v656_v46, %v641_v47 }
 0xcf9   :  { %661 = vadd.xlane.f32.xlu0 %v660_v48 }
 0xd24   :  { %v608_v49 = vpop.xlane.xlu0 %607 }
 0xd25   :  { %v609_v50 = vsel %vm593_vm8, %v608_v49, %v587_v35 }
 0xd26   :  { %v628_v51 = vmul.f32 %v612_v16, %v609_v50 }
 0xd28   :  { %629 = vadd.xlane.f32.xlu1 %v628_v51 }
 0xd2c   :  { %v626_v52 = vpop.xlane.xlu0 %625 }
 0xd2d   :  { %v627_v53 = vsel %vm615_vm9, %v626_v52, %v605_v38 }
 0xd2e   :  { %v646_v55 = vmul.f32 %v634_v31, %v627_v53 }
 0xd30   :  { %647 = vadd.xlane.f32.xlu1 %v646_v55 }
 0xd48   :  { %v644_v56 = vpop.xlane.xlu0 %643 }
 0xd49   :  { %v645_v57 = vsel %vm637_vm10, %v644_v56, %v623_v41 }
 0xd4a   :  { %v664_v58 = vmul.f32 %v656_v46, %v645_v57 }
 0xd4c   :  { %665 = vadd.xlane.f32.xlu1 %v664_v58 }
 0xd6c   :  { %v662_v60 = vpop.xlane.xlu0 %661 }
 0xd6d   :  { %v663_v63 = vsel %vm659_vm12, %v662_v60, %v641_v47 }
 0xd6e   :  { %v681_v0 = vmul.f32 %v677_v62, %v663_v63 }
 0xd70   :  { %682 = vadd.xlane.f32.xlu1 %v681_v0 }
 0xd9b   :  { %v630_v3 = vpop.xlane.xlu1 %629 }
 0xd9c   :  { %v631_v4 = vsel %vm615_vm9, %v630_v3, %v609_v50 }
 0xd9d   :  { %v650_v5 = vmul.f32 %v634_v31, %v631_v4 }
 0xd9f   :  { %651 = vadd.xlane.f32.xlu2 %v650_v5 }
 0xda3   :  { %v648_v8 = vpop.xlane.xlu1 %647 }
 0xda4   :  { %v649_v9 = vsel %vm637_vm10, %v648_v8, %v627_v53 }
 0xda5   :  { %v668_v10 = vmul.f32 %v656_v46, %v649_v9 }
 0xda7   :  { %669 = vadd.xlane.f32.xlu2 %v668_v10 }
 0xdbf   :  { %v666_v11 = vpop.xlane.xlu1 %665 }
 0xdc0   :  { %v667_v13 = vsel %vm659_vm12, %v666_v11, %v645_v57 }
 0xdc1   :  { %v685_v14 = vmul.f32 %v677_v62, %v667_v13 }
 0xdc3   :  { %686 = vadd.xlane.f32.xlu2 %v685_v14 }
 0xde3   :  { %v683_v15 = vpop.xlane.xlu1 %682 }
 0xde4   :  { %v684_v16 = vsel %vm680_vm13, %v683_v15, %v663_v63 }
 0xde5   :  { %v711_v19 = vmul.f32 %v684_v16, %v1026_v12 }
 0xde7   :  { %v713_v20 = vsel %vm66_vm11, %v684_v16, %v711_v19 }
 0xde8   :  { %807 = vst [vmem:[%s1142_s1] sm:$0xff] %v713_v20 }
 0xe12   :  { %v652_v21 = vpop.xlane.xlu2 %651 }
 0xe13   :  { %v653_v22 = vsel %vm637_vm10, %v652_v21, %v631_v4 }
 0xe14   :  { %v672_v23 = vmul.f32 %v656_v46, %v653_v22 }
 0xe16   :  { %673 = vadd.xlane.f32.xlu0 %v672_v23 }
 0xe1a   :  { %v670_v24 = vpop.xlane.xlu2 %669 }
 0xe1b   :  { %v671_v25 = vsel %vm659_vm12, %v670_v24, %v649_v9 }
 0xe1c   :  { %v689_v2 = vmul.f32 %v677_v62, %v671_v25 }
 0xe1e   :  { %690 = vadd.xlane.f32.xlu0 %v689_v2 }
 0xe36   :  { %v687_v12 = vpop.xlane.xlu2 %686 }
 0xe37   :  { %v688_v61 = vsel %vm680_vm13, %v687_v12, %v667_v13 }
 0xe38   :  { %v729_v7 = vmul.f32 %v688_v61, %v953_v29 }
 0xe3a   :  { %v731_v26 = vsel %vm95_vm7, %v688_v61, %v729_v7 }
 0xe3b   :  { %809 = vst [vmem:[%s1142_s1 + $0x8] sm:$0xff] %v731_v26 }
 0xe89   :  { %v674_v27 = vpop.xlane.xlu0 %673 }
 0xe8a   :  { %v675_v28 = vsel %vm659_vm12, %v674_v27, %v653_v22 }
 0xe8b   :  { %v693_v30 = vmul.f32 %v677_v62, %v675_v28 }
 0xe8d   :  { %694 = vadd.xlane.f32.xlu1 %v693_v30 }
 0xe91   :  { %v691_v31 = vpop.xlane.xlu0 %690 }
 0xe92   :  { %v692_v32 = vsel %vm680_vm13, %v691_v31, %v671_v25 }
 0xe93   :  { %v748_v33 = vmul.f32 %v692_v32, %v894_v54 }
 0xe95   :  { %v750_v18 = vsel %vm124_vm15, %v692_v32, %v748_v33 }
 0xe96   :  { %811 = vst [vmem:[%s1142_s1 + $0x10] sm:$0xff] %v750_v18 }
 0xf00   :  { %v695_v29 = vpop.xlane.xlu1 %694 }
 0xf01   :  { %v696_v34 = vsel %vm680_vm13, %v695_v29, %v675_v28 }
 0xf02   :  { %v767_v35 = vmul.f32 %v696_v34, %v869_v17 }
 0xf04   :  { %v769_v36 = vsel %vm153_vm5, %v696_v34, %v767_v35 }
 0xf05   :  { %813 = vst [vmem:[%s1142_s1 + $0x18] sm:$0xff] %v769_v36 }

// kernel: householder_linear.1
= control target key start
LH: loop header
LB: loop body
LE: loop exit
PB: predicated region body
PF: predicated region fallthrough
CT: control target
= control target key end

     0   :  { %s138_s1 = inlined_call_operand.vmem [shape: f32[128,128], index: 1, kind: input, shape index: {}]   ;;  %s139_s2 = inlined_call_operand.vmem [shape: f32[1,128], index: 2, kind: input, shape index: {}]   ;;  %s140_s0 = inlined_call_operand.vmem [shape: f32[4,128], index: 0, kind: input, shape index: {}]   ;;  %s141_s3 = inlined_call_operand.vmem [shape: f32[4,128], index: 3, kind: output, shape index: {}]  }
   0x1   :  { %v30_v0 = vld [vmem:[%s138_s1 + $0x78] sm:$0xff]  ;;  %v29_v1 = vld [vmem:[%s138_s1 + $0x70] sm:$0xff]  ;;  %v28_v2 = vld [vmem:[%s138_s1 + $0x68] sm:$0xff] }
   0x2   :  { %35 = vmatpush.msra.mxu0 %v30_v0  ;;  %v27_v3 = vld [vmem:[%s138_s1 + $0x60] sm:$0xff]  ;;  %v26_v4 = vld [vmem:[%s138_s1 + $0x58] sm:$0xff]  ;;  %v25_v5 = vld [vmem:[%s138_s1 + $0x50] sm:$0xff] }
   0x3   :  { %v24_v6 = vld [vmem:[%s138_s1 + $0x48] sm:$0xff]  ;;  %v23_v7 = vld [vmem:[%s138_s1 + $0x40] sm:$0xff]  ;;  %v22_v8 = vld [vmem:[%s138_s1 + $0x38] sm:$0xff] }
   0x4   :  { %36 = vmatpush.msra.mxu0 %v29_v1  ;;  %v21_v9 = vld [vmem:[%s138_s1 + $0x30] sm:$0xff]  ;;  %v20_v10 = vld [vmem:[%s138_s1 + $0x28] sm:$0xff]  ;;  %v19_v11 = vld [vmem:[%s138_s1 + $0x20] sm:$0xff] }
   0x5   :  { %v18_v12 = vld [vmem:[%s138_s1 + $0x18] sm:$0xff]  ;;  %v17_v13 = vld [vmem:[%s138_s1 + $0x10] sm:$0xff]  ;;  %v16_v14 = vld [vmem:[%s138_s1 + $0x8] sm:$0xff] }
   0x6   :  { %37 = vmatpush.msra.mxu0 %v28_v2  ;;  %v15_v15 = vld [vmem:[%s138_s1] sm:$0xff] }
   0x7   :  { %v14_v16 = vld [vmem:[%s140_s0] sm:$0xf] }
   0x8   :  { %38 = vmatpush.msra.mxu0 %v27_v3  ;;  %v60_v17 = vld [vmem:[%s139_s2] ss:$0 sm:$0xff] }
   0xa   :  { %39 = vmatpush.msra.mxu0 %v26_v4 }
   0xc   :  { %40 = vmatpush.msra.mxu0 %v25_v5 }
   0xe   :  { %41 = vmatpush.msra.mxu0 %v24_v6 }
  0x10   :  { %42 = vmatpush.msra.mxu0 %v23_v7 }
  0x12   :  { %43 = vmatpush.msra.mxu0 %v22_v8 }
  0x14   :  { %44 = vmatpush.msra.mxu0 %v21_v9 }
  0x16   :  { %45 = vmatpush.msra.mxu0 %v20_v10 }
  0x18   :  { %46 = vmatpush.msra.mxu0 %v19_v11 }
  0x1a   :  { %47 = vmatpush.msra.mxu0 %v18_v12 }
  0x1c   :  { %48 = vmatpush.msra.mxu0 %v17_v13 }
  0x1e   :  { %49 = vmatpush.msra.mxu0 %v16_v14 }
  0x20   :  { %50 = vmatpush.msra.mxu0 %v15_v15 }
  0x21   :  { %51 = vmatmul.f32.vlgmr.msra.gmra.mxu0 %v14_v16 }
  0x9e   :  { %v52_v18 = vpop.f32.mrf.mxu0 }
  0x9f   :  { %v53_v19 = vadd.f32 %v60_v17, %v52_v18 }
  0xa1   :  { %55 = vst [vmem:[%s141_s3] sm:$0xf] %v53_v19 }

</bundles_post_ra>
